<compile_context>
chip_gen: v7x
topology: tpu7x:2x2x1
jax: 0.10.0
libtpu: 0.0.40
codegen_flags: <defaults>
</compile_context>

<pallas_src>
from functools import partial

import numpy as np
import jax
import jax.numpy as jnp
from jax import lax
from jax.experimental import pallas as pl
from jax.experimental.pallas import tpu as pltpu

EPS = 1e-5  # nn.BatchNorm1d default


# ---------------------------------------------------------------------------
# In-kernel helper: per-channel reduction over positions, replicated back
# ---------------------------------------------------------------------------
def _channel_sum_replicated(row, C, width):
    """row: (1, width) in the flat (l*C + c) lane layout.  Returns (1, width) where every
    lane holds sum_l row[:, l*C + c] for its channel c -- i.e. the per-channel reduction
    already broadcast back over positions.  Uses only 128-aligned lane folds (whole-vreg
    adds) plus single-vreg cyclic XLU rolls: no MXU, no selector matrices."""
    w = width
    # Fold multi-vreg lane extents down to a single 128-lane vreg.
    while w > 128:
        half = w // 2
        row = row[:, :half] + row[:, half:w]
        w = half
    # Cyclic tree-add within the vreg: offsets {0, C, 2C, ...} cover every position slot.
    s = C
    while s < w:
        row = row + pltpu.roll(row, shift=s, axis=1)
        s *= 2
    # Replicate back to full width with 128-aligned lane concatenation.
    if w < width:
        row = jnp.concatenate([row] * (width // w), axis=1)
    return row


# ---------------------------------------------------------------------------
# Pallas kernel: conv1 -> bn1 -> relu -> conv2 -> bn2 -> relu -> fc
# ---------------------------------------------------------------------------
def _simple_cnn1d_kernel(x_ref, pa_ref, pb_ref, out_ref, *, B, B_pad, L, C1, C2, NC):
    LC1, LC2 = L * C1, L * C2
    inv_n = 1.0 / float(B * L)                # BN sample count: real batch rows only

    # ---- static Ref-view slices into the packed slabs (no load-then-slice) ----------
    w1 = pa_ref[0:L, :]                       # (L, L*C1)    dense conv1
    g1 = pa_ref[L:L + 1, :]                   # (1, L*C1)    gamma1 pre-tiled over positions
    b1 = pa_ref[L + 1:L + 2, :]               # (1, L*C1)    beta1 pre-tiled

    w2 = pb_ref[0:LC1, :]                     # (L*C1, L*C2) dense banded conv2
    g2 = pb_ref[LC1:LC1 + 1, :]               # (1, L*C2)
    b2 = pb_ref[LC1 + 1:LC1 + 2, :]           # (1, L*C2)
    fcw_t = pb_ref[LC1 + 2:LC1 + 2 + NC, :]   # (NC, L*C2)   fc weight in (l*C2 + c) order
    fcb = pb_ref[LC1 + 2 + NC:LC1 + 3 + NC, 0:NC]   # (1, NC)

    x = x_ref[...]                            # (B_pad, L); padded rows are zero

    # Row mask: 1.0 for real batch rows, 0.0 for sublane padding rows.
    row_ids = lax.broadcasted_iota(jnp.int32, (B_pad, 1), 0)
    row_mask = jnp.where(row_ids < B, 1.0, 0.0).astype(jnp.float32)

    def bn_relu(h, C, width, gamma_t, beta_t):
        # Training-mode BatchNorm over (batch, position) per channel, fused with ReLU.
        colsum = jnp.sum(h, axis=0, keepdims=True)        # (1, width); padded rows are 0
        colsq = jnp.sum(h * h, axis=0, keepdims=True)
        s1 = _channel_sum_replicated(colsum, C, width)    # per-channel sum, replicated
        s2 = _channel_sum_replicated(colsq, C, width)
        mean = s1 * inv_n
        # Single-pass variance E[h^2]-E[h]^2 in f32; fine at n=B*L=32 (two-pass preferred
        # at larger scale -- see TODO at top).
        var = s2 * inv_n - mean * mean
        scale = gamma_t * lax.rsqrt(var + EPS)
        shift = beta_t - mean * scale
        return jnp.maximum(h * scale + shift, 0.0)

    # conv1 (bias dropped: cancelled exactly by batch-stats BN) -> bn1 -> relu
    h1 = jnp.dot(x, w1, preferred_element_type=jnp.float32)           # (B_pad, L*C1)
    # re-zero padded rows so layer-2 BN statistics only see the real batch
    a1 = bn_relu(h1, C1, LC1, g1, b1) * row_mask

    # conv2 -> bn2 -> relu
    h2 = jnp.dot(a1, w2, preferred_element_type=jnp.float32)          # (B_pad, L*C2)
    a2 = bn_relu(h2, C2, LC2, g2, b2)

    # fc: contract last axes (A @ B^T) against the compact (NC, L*C2) weight rows.
    logits = lax.dot_general(a2, fcw_t, (((1,), (1,)), ((), ())),
                             preferred_element_type=jnp.float32)      # (B_pad, NC)
    out_ref[...] = logits + fcb


# ---------------------------------------------------------------------------
# One-time host-side packing (hoisted out of the per-call hot path)
# ---------------------------------------------------------------------------
def _conv1d_to_dense(w, L):
    """Conv1d(K, padding=(K-1)//2) weight (Cout, Cin, K) -> dense (L*Cin, L*Cout) matrix
    acting on the flat (l*Cin + ci) layout and producing the flat (l*Cout + co) layout."""
    w = np.asarray(w, dtype=np.float32)
    Cout, Cin, K = w.shape
    pad = (K - 1) // 2
    Wd = np.zeros((L * Cin, L * Cout), dtype=np.float32)
    for l_out in range(L):
        for k in range(K):
            l_in = l_out + k - pad
            if 0 <= l_in < L:
                Wd[l_in * Cin:(l_in + 1) * Cin,
                   l_out * Cout:(l_out + 1) * Cout] = w[:, :, k].T
    return Wd


def pack_simple_cnn1d_params(params, *, num_features=8, num_classes=2):
    """Build the two packed parameter slabs ONCE.  Note: np.asarray on JAX-array params
    forces a device->host copy; doing it here (and only here) keeps it off the hot path."""
    L, NC = num_features, num_classes
    C1, C2 = 16, 32
    LC1, LC2 = L * C1, L * C2
    assert L > 0 and (L & (L - 1)) == 0, "roll-based BN reduction assumes power-of-two L"

    w1 = np.asarray(params["w1"], np.float32)
    g1 = np.asarray(params["g1"], np.float32)
    be1 = np.asarray(params["be1"], np.float32)
    w2 = np.asarray(params["w2"], np.float32)
    g2 = np.asarray(params["g2"], np.float32)
    be2 = np.asarray(params["be2"], np.float32)
    fcw = np.asarray(params["fcw"], np.float32)
    fcb = np.asarray(params["fcb"], np.float32)
    # params["b1"], params["b2"] are intentionally NOT shipped: training-mode BatchNorm
    # cancels the conv bias exactly (verified numerically against the reference below).

    # slab A (width L*C1): dense conv1 + pre-tiled bn1 gamma/beta
    pack_a = np.zeros((L + 2, LC1), np.float32)
    pack_a[0:L, :] = _conv1d_to_dense(w1, L)
    pack_a[L, :] = np.tile(g1, L)
    pack_a[L + 1, :] = np.tile(be1, L)

    # slab B (width L*C2): dense banded conv2 + pre-tiled bn2 gamma/beta + compact fc
    pack_b = np.zeros((LC1 + 3 + NC, LC2), np.float32)
    pack_b[0:LC1, :] = _conv1d_to_dense(w2, L)
    pack_b[LC1, :] = np.tile(g2, L)
    pack_b[LC1 + 1, :] = np.tile(be2, L)
    # PyTorch flattens (B, C2, L) channel-major (c*L + l); permute to the kernel's
    # (l*C2 + c) order.  Stored as NC rows of width L*C2 -- no 128-lane zero padding.
    pack_b[LC1 + 2:LC1 + 2 + NC, :] = (
        fcw.reshape(NC, C2, L).transpose(0, 2, 1).reshape(NC, LC2))
    pack_b[LC1 + 2 + NC, 0:NC] = fcb

    return jnp.asarray(pack_a), jnp.asarray(pack_b)


# ---------------------------------------------------------------------------
# Per-call hot path: pad x on device, launch one pallas_call, slice the result
# ---------------------------------------------------------------------------
@partial(jax.jit, static_argnames=("num_features", "num_classes"))
def simple_cnn1d_forward(x, pack_a, pack_b, *, num_features=8, num_classes=2):
    L, NC = num_features, num_classes
    C1, C2 = 16, 32
    B = x.shape[0]
    B_pad = ((B + 7) // 8) * 8                 # fill vreg sublanes

    x_pad = jnp.pad(x.astype(jnp.float32), ((0, B_pad - B), (0, 0)))

    vmem = pl.BlockSpec(memory_space=pltpu.MemorySpace.VMEM)
    kernel = partial(_simple_cnn1d_kernel, B=B, B_pad=B_pad, L=L, C1=C1, C2=C2, NC=NC)
    out = pl.pallas_call(
        kernel,
        out_shape=jax.ShapeDtypeStruct((B_pad, NC), jnp.float32),
        in_specs=[vmem, vmem, vmem],
        out_specs=vmem,
        # Working set: ~150 KB of slabs + a few vregs of activations.  4 MiB leaves ample
        # headroom and stays far under every generation's scoped VMEM (incl. v7x 32 MiB).
        compiler_params=pltpu.CompilerParams(vmem_limit_bytes=4 * 1024 * 1024),
    )(x_pad, pack_a, pack_b)
    return out[:B, :]


# ---------------------------------------------------------------------------
# Pure-JAX reference (mirrors PyTorch forward, training-mode BatchNorm, keeps conv biases)
# ---------------------------------------------------------------------------
def reference_forward(x, params, *, num_features=8, num_classes=2):
    L = num_features
    x = jnp.asarray(x, jnp.float32)
    h = x[:, None, :]                                      # (B, 1, L) == unsqueeze(1)

    def conv1d(h, w, b):
        K = w.shape[-1]
        hp = jnp.pad(h, ((0, 0), (0, 0), (1, 1)))
        cols = jnp.stack([hp[:, :, k:k + L] for k in range(K)], axis=-1)  # (B,Cin,L,K)
        return jnp.einsum("bilk,oik->bol", cols, w) + b[None, :, None]

    def bn_relu(h, g, be):
        mean = jnp.mean(h, axis=(0, 2), keepdims=True)
        var = jnp.mean((h - mean) ** 2, axis=(0, 2), keepdims=True)   # biased
        y = (h - mean) * lax.rsqrt(var + EPS) * g[None, :, None] + be[None, :, None]
        return jnp.maximum(y, 0.0)

    h = bn_relu(conv1d(h, params["w1"], params["b1"]), params["g1"], params["be1"])
    h = bn_relu(conv1d(h, params["w2"], params["b2"]), params["g2"], params["be2"])
    flat = h.reshape(h.shape[0], -1)                        # channel-major flatten
    return flat @ params["fcw"].T + params["fcb"][None, :]


# ---------------------------------------------------------------------------
if __name__ == "__main__":
    B, L, NUM_CLASSES = 4, 8, 2
    key = jax.random.PRNGKey(0)
    ks = jax.random.split(key, 8)

    params = {
        "w1": 0.3 * jax.random.normal(ks[0], (16, 1, 3), jnp.float32),
        "b1": 0.1 * jax.random.normal(ks[1], (16,), jnp.float32),
        "g1": 1.0 + 0.1 * jax.random.normal(ks[2], (16,), jnp.float32),
        "be1": 0.05 * jax.random.normal(ks[3], (16,), jnp.float32),
        "w2": 0.2 * jax.random.normal(ks[4], (32, 16, 3), jnp.float32),
        "b2": 0.1 * jax.random.normal(ks[5], (32,), jnp.float32),
        "g2": 1.0 + 0.1 * jax.random.normal(ks[6], (32,), jnp.float32),
        "be2": 0.05 * jax.random.normal(ks[7], (32,), jnp.float32),
    }
    kf = jax.random.split(jax.random.PRNGKey(1), 3)
    params["fcw"] = 0.1 * jax.random.normal(kf[0], (NUM_CLASSES, 32 * L), jnp.float32)
    params["fcb"] = 0.05 * jax.random.normal(kf[1], (NUM_CLASSES,), jnp.float32)

    x = jax.random.normal(kf[2], (B, L), jnp.float32)

    # One-time packing (cold path), then the jitted hot path.
    pack_a, pack_b = pack_simple_cnn1d_params(params, num_features=L,
                                              num_classes=NUM_CLASSES)
    out = simple_cnn1d_forward(x, pack_a, pack_b,
                               num_features=L, num_classes=NUM_CLASSES)
    out = jax.block_until_ready(out)
    # Steady-state call (compile + packing already amortized).
    out = jax.block_until_ready(
        simple_cnn1d_forward(x, pack_a, pack_b,
                             num_features=L, num_classes=NUM_CLASSES))

    ref = reference_forward(x, params, num_features=L, num_classes=NUM_CLASSES)
    np.testing.assert_allclose(np.asarray(out), np.asarray(ref), rtol=1e-4, atol=1e-4)

    print("KERNEL_OK")
</pallas_src>

<mosaic_0001>
module attributes {stable_mosaic.version = 11 : i64} {
  func.func @_simple_cnn1d_kernel(%arg0: memref<8x8xf32, #tpu.memory_space<vmem>>, %arg1: memref<10x128xf32, #tpu.memory_space<vmem>>, %arg2: memref<133x256xf32, #tpu.memory_space<vmem>>, %arg3: memref<8x2xf32, #tpu.memory_space<vmem>>) attributes {dimension_semantics = [], scalar_prefetch = 0 : i64, scratch_operands = 0 : i64, tpu.core_type = #tpu.core_type<tc>} {
    %c0 = arith.constant 0 : index
    %c0_0 = arith.constant 0 : index
    %0 = vector.load %arg1[%c0, %c0_0] : memref<10x128xf32, #tpu.memory_space<vmem>>, vector<8x128xf32>
    %c8 = arith.constant 8 : index
    %c0_1 = arith.constant 0 : index
    %1 = vector.load %arg1[%c8, %c0_1] : memref<10x128xf32, #tpu.memory_space<vmem>>, vector<1x128xf32>
    %c9 = arith.constant 9 : index
    %c0_2 = arith.constant 0 : index
    %2 = vector.load %arg1[%c9, %c0_2] : memref<10x128xf32, #tpu.memory_space<vmem>>, vector<1x128xf32>
    %c0_3 = arith.constant 0 : index
    %c0_4 = arith.constant 0 : index
    %3 = vector.load %arg2[%c0_3, %c0_4] : memref<133x256xf32, #tpu.memory_space<vmem>>, vector<128x256xf32>
    %c128 = arith.constant 128 : index
    %c0_5 = arith.constant 0 : index
    %4 = vector.load %arg2[%c128, %c0_5] : memref<133x256xf32, #tpu.memory_space<vmem>>, vector<1x256xf32>
    %c129 = arith.constant 129 : index
    %c0_6 = arith.constant 0 : index
    %5 = vector.load %arg2[%c129, %c0_6] : memref<133x256xf32, #tpu.memory_space<vmem>>, vector<1x256xf32>
    %c130 = arith.constant 130 : index
    %c0_7 = arith.constant 0 : index
    %6 = vector.load %arg2[%c130, %c0_7] : memref<133x256xf32, #tpu.memory_space<vmem>>, vector<2x256xf32>
    %c132 = arith.constant 132 : index
    %c0_8 = arith.constant 0 : index
    %7 = vector.load %arg2[%c132, %c0_8] : memref<133x256xf32, #tpu.memory_space<vmem>>, vector<1x2xf32>
    %c0_9 = arith.constant 0 : index
    %c0_10 = arith.constant 0 : index
    %8 = vector.load %arg0[%c0_9, %c0_10] : memref<8x8xf32, #tpu.memory_space<vmem>>, vector<8x8xf32>
    %9 = tpu.iota {dimensions = array<i32: 0>} : vector<8x1xi32>
    %c4_i32 = arith.constant 4 : i32
    %10 = vector.broadcast %c4_i32 : i32 to vector<8x1xi32>
    %11 = arith.cmpi slt, %9, %10 : vector<8x1xi32>
    %cst = arith.constant 1.000000e+00 : f32
    %cst_11 = arith.constant 0.000000e+00 : f32
    %12 = vector.broadcast %cst : f32 to vector<8x1xf32>
    %13 = vector.broadcast %cst_11 : f32 to vector<8x1xf32>
    %14 = arith.select %11, %12, %13 : vector<8x1xi1>, vector<8x1xf32>
    %cst_12 = arith.constant dense<0.000000e+00> : vector<8x128xf32>
    %15 = tpu.matmul %8, %0, %cst_12 {dimension_numbers = #tpu.dot_dimension_numbers<[1], [0], [0], [1], [0, 0, 1, 1], [], []>} : vector<8x8xf32>, vector<8x128xf32>, vector<8x128xf32> -> vector<8x128xf32>
    %cst_13 = arith.constant dense<0.000000e+00> : vector<128xf32>
    %16 = vector.multi_reduction <add>, %15, %cst_13 [0] : vector<8x128xf32> to vector<128xf32>
    %17 = vector.shape_cast %16 : vector<128xf32> to vector<1x128xf32>
    %18 = arith.mulf %15, %15 : vector<8x128xf32>
    %cst_14 = arith.constant dense<0.000000e+00> : vector<128xf32>
    %19 = vector.multi_reduction <add>, %18, %cst_14 [0] : vector<8x128xf32> to vector<128xf32>
    %20 = vector.shape_cast %19 : vector<128xf32> to vector<1x128xf32>
    %c16_i32 = arith.constant 16 : i32
    %21 = tpu.dynamic_rotate %17 by %c16_i32 dim 1 : vector<1x128xf32>, i32 -> vector<1x128xf32>
    %22 = arith.addf %17, %21 : vector<1x128xf32>
    %c32_i32 = arith.constant 32 : i32
    %23 = tpu.dynamic_rotate %22 by %c32_i32 dim 1 : vector<1x128xf32>, i32 -> vector<1x128xf32>
    %24 = arith.addf %22, %23 : vector<1x128xf32>
    %c64_i32 = arith.constant 64 : i32
    %25 = tpu.dynamic_rotate %24 by %c64_i32 dim 1 : vector<1x128xf32>, i32 -> vector<1x128xf32>
    %26 = arith.addf %24, %25 : vector<1x128xf32>
    %c16_i32_15 = arith.constant 16 : i32
    %27 = tpu.dynamic_rotate %20 by %c16_i32_15 dim 1 : vector<1x128xf32>, i32 -> vector<1x128xf32>
    %28 = arith.addf %20, %27 : vector<1x128xf32>
    %c32_i32_16 = arith.constant 32 : i32
    %29 = tpu.dynamic_rotate %28 by %c32_i32_16 dim 1 : vector<1x128xf32>, i32 -> vector<1x128xf32>
    %30 = arith.addf %28, %29 : vector<1x128xf32>
    %c64_i32_17 = arith.constant 64 : i32
    %31 = tpu.dynamic_rotate %30 by %c64_i32_17 dim 1 : vector<1x128xf32>, i32 -> vector<1x128xf32>
    %32 = arith.addf %30, %31 : vector<1x128xf32>
    %cst_18 = arith.constant 3.125000e-02 : f32
    %33 = vector.broadcast %cst_18 : f32 to vector<1x128xf32>
    %34 = arith.mulf %26, %33 : vector<1x128xf32>
    %cst_19 = arith.constant 3.125000e-02 : f32
    %35 = vector.broadcast %cst_19 : f32 to vector<1x128xf32>
    %36 = arith.mulf %32, %35 : vector<1x128xf32>
    %37 = arith.mulf %34, %34 : vector<1x128xf32>
    %38 = arith.subf %36, %37 : vector<1x128xf32>
    %cst_20 = arith.constant 9.99999974E-6 : f32
    %39 = vector.broadcast %cst_20 : f32 to vector<1x128xf32>
    %40 = arith.addf %38, %39 : vector<1x128xf32>
    %41 = math.rsqrt %40 : vector<1x128xf32>
    %42 = arith.mulf %1, %41 : vector<1x128xf32>
    %43 = arith.mulf %34, %42 : vector<1x128xf32>
    %44 = arith.subf %2, %43 : vector<1x128xf32>
    %45 = vector.broadcast %42 : vector<1x128xf32> to vector<8x128xf32>
    %46 = arith.mulf %15, %45 : vector<8x128xf32>
    %47 = vector.broadcast %44 : vector<1x128xf32> to vector<8x128xf32>
    %48 = arith.addf %46, %47 : vector<8x128xf32>
    %cst_21 = arith.constant 0.000000e+00 : f32
    %49 = vector.broadcast %cst_21 : f32 to vector<8x128xf32>
    %50 = arith.maximumf %48, %49 : vector<8x128xf32>
    %51 = vector.broadcast %14 : vector<8x1xf32> to vector<8x128xf32>
    %52 = arith.mulf %50, %51 : vector<8x128xf32>
    %cst_22 = arith.constant dense<0.000000e+00> : vector<8x256xf32>
    %53 = tpu.matmul %52, %3, %cst_22 {dimension_numbers = #tpu.dot_dimension_numbers<[1], [0], [0], [1], [0, 0, 1, 1], [], []>} : vector<8x128xf32>, vector<128x256xf32>, vector<8x256xf32> -> vector<8x256xf32>
    %cst_23 = arith.constant dense<0.000000e+00> : vector<256xf32>
    %54 = vector.multi_reduction <add>, %53, %cst_23 [0] : vector<8x256xf32> to vector<256xf32>
    %55 = vector.shape_cast %54 : vector<256xf32> to vector<1x256xf32>
    %56 = arith.mulf %53, %53 : vector<8x256xf32>
    %cst_24 = arith.constant dense<0.000000e+00> : vector<256xf32>
    %57 = vector.multi_reduction <add>, %56, %cst_24 [0] : vector<8x256xf32> to vector<256xf32>
    %58 = vector.shape_cast %57 : vector<256xf32> to vector<1x256xf32>
    %59 = vector.extract_strided_slice %55 {offsets = [0, 0], sizes = [1, 128], strides = [1, 1]} : vector<1x256xf32> to vector<1x128xf32>
    %60 = vector.extract_strided_slice %55 {offsets = [0, 128], sizes = [1, 128], strides = [1, 1]} : vector<1x256xf32> to vector<1x128xf32>
    %61 = arith.addf %59, %60 : vector<1x128xf32>
    %c32_i32_25 = arith.constant 32 : i32
    %62 = tpu.dynamic_rotate %61 by %c32_i32_25 dim 1 : vector<1x128xf32>, i32 -> vector<1x128xf32>
    %63 = arith.addf %61, %62 : vector<1x128xf32>
    %c64_i32_26 = arith.constant 64 : i32
    %64 = tpu.dynamic_rotate %63 by %c64_i32_26 dim 1 : vector<1x128xf32>, i32 -> vector<1x128xf32>
    %65 = arith.addf %63, %64 : vector<1x128xf32>
    %66 = tpu.concatenate %65, %65 in 1 : vector<1x128xf32>, vector<1x128xf32> -> vector<1x256xf32>
    %67 = vector.extract_strided_slice %58 {offsets = [0, 0], sizes = [1, 128], strides = [1, 1]} : vector<1x256xf32> to vector<1x128xf32>
    %68 = vector.extract_strided_slice %58 {offsets = [0, 128], sizes = [1, 128], strides = [1, 1]} : vector<1x256xf32> to vector<1x128xf32>
    %69 = arith.addf %67, %68 : vector<1x128xf32>
    %c32_i32_27 = arith.constant 32 : i32
    %70 = tpu.dynamic_rotate %69 by %c32_i32_27 dim 1 : vector<1x128xf32>, i32 -> vector<1x128xf32>
    %71 = arith.addf %69, %70 : vector<1x128xf32>
    %c64_i32_28 = arith.constant 64 : i32
    %72 = tpu.dynamic_rotate %71 by %c64_i32_28 dim 1 : vector<1x128xf32>, i32 -> vector<1x128xf32>
    %73 = arith.addf %71, %72 : vector<1x128xf32>
    %74 = tpu.concatenate %73, %73 in 1 : vector<1x128xf32>, vector<1x128xf32> -> vector<1x256xf32>
    %cst_29 = arith.constant 3.125000e-02 : f32
    %75 = vector.broadcast %cst_29 : f32 to vector<1x256xf32>
    %76 = arith.mulf %66, %75 : vector<1x256xf32>
    %cst_30 = arith.constant 3.125000e-02 : f32
    %77 = vector.broadcast %cst_30 : f32 to vector<1x256xf32>
    %78 = arith.mulf %74, %77 : vector<1x256xf32>
    %79 = arith.mulf %76, %76 : vector<1x256xf32>
    %80 = arith.subf %78, %79 : vector<1x256xf32>
    %cst_31 = arith.constant 9.99999974E-6 : f32
    %81 = vector.broadcast %cst_31 : f32 to vector<1x256xf32>
    %82 = arith.addf %80, %81 : vector<1x256xf32>
    %83 = math.rsqrt %82 : vector<1x256xf32>
    %84 = arith.mulf %4, %83 : vector<1x256xf32>
    %85 = arith.mulf %76, %84 : vector<1x256xf32>
    %86 = arith.subf %5, %85 : vector<1x256xf32>
    %87 = vector.broadcast %84 : vector<1x256xf32> to vector<8x256xf32>
    %88 = arith.mulf %53, %87 : vector<8x256xf32>
    %89 = vector.broadcast %86 : vector<1x256xf32> to vector<8x256xf32>
    %90 = arith.addf %88, %89 : vector<8x256xf32>
    %cst_32 = arith.constant 0.000000e+00 : f32
    %91 = vector.broadcast %cst_32 : f32 to vector<8x256xf32>
    %92 = arith.maximumf %90, %91 : vector<8x256xf32>
    %cst_33 = arith.constant dense<0.000000e+00> : vector<8x2xf32>
    %93 = tpu.matmul %92, %6, %cst_33 {dimension_numbers = #tpu.dot_dimension_numbers<[1], [1], [0], [0], [0, 0, 1, 0], [], []>} : vector<8x256xf32>, vector<2x256xf32>, vector<8x2xf32> -> vector<8x2xf32>
    %94 = vector.broadcast %7 : vector<1x2xf32> to vector<8x2xf32>
    %95 = arith.addf %93, %94 : vector<8x2xf32>
    %c0_34 = arith.constant 0 : index
    %c0_35 = arith.constant 0 : index
    %96 = vector.load %arg3[%c0_34, %c0_35] : memref<8x2xf32, #tpu.memory_space<vmem>>, vector<8x2xf32>
    tpu.vector_store %arg3[%c0_34, %c0_35], %95 {strides = array<i32>} : memref<8x2xf32, #tpu.memory_space<vmem>>, vector<8x2xf32>,
    return
  }
}

</mosaic_0001>

<bundles_post_ra>
// kernel: simple_cnn1d_forward.1
= control target key start
LH: loop header
LB: loop body
LE: loop exit
PB: predicated region body
PF: predicated region fallthrough
CT: control target
= control target key end

     0   :  { %8 = vsyncpa [#allocation3], 0  ;;  %s544_s12 = smov [#allocation2]   ;;  %s644_s0 = inlined_call_operand.vmem [shape: f32[8,8], index: 0, kind: input, shape index: {}]   ;;  %s645_s1 = inlined_call_operand.vmem [shape: f32[10,128], index: 1, kind: input, shape index: {}]   ;;  %s646_s2 = inlined_call_operand.hbm [shape: f32[133,256], index: 2, kind: input, shape index: {}]   ;;  %s647_s3 = inlined_call_operand.vmem [shape: f32[8,2], index: 3, kind: output, shape index: {}]  }
   0x1   :  { %s18_s13 = sshll.u32 %s544_s12, 4  ;;  %s520_s16 = scalar_lea.hbm %s646_s2, 4352  ;;  %s19_s13 = int_to_ptr.vmem [resolvable:$true] %s18_s13 }
   0x2   :  { %p521_p0 = scmp.ne.s32.totalorder %s646_s2, %s520_s16  ;;  %p524_p1 = scmp.lt.u32.totalorder %s520_s16, %s646_s2 }
   0x4   :  { %p526_p2 = pnand %p524_p1, %p521_p0 }
   0x6   :  { %529 = shalt.err (!%p526_p2)
}
   0x7   :  { %s530_s21 = scalar_lea.vmem %s19_s13, 4352  ;;  %p535_p4 = scmp.lt.s32.totalorder %s19_s13, %s19_s13 }
   0x8   :  { %p531_p3 = scmp.ne.s32.totalorder %s19_s13, %s530_s21  ;;  %p536_p5 = scmp.lt.s32.totalorder %s530_s21, %s530_s21 }
   0xa   :  { %p537_p6 = por %p536_p5, %p535_p4 }
   0xc   :  { %p538_p7 = pnand %p537_p6, %p531_p3 }
   0xe   :  { %541 = shalt.err (!%p538_p7)
}
   0xf   :  { %s545_s22 = smov 256   ;;  %s546_s23 = smov 16  }
  0x10   :  { %24 = dma.hbm_to_vmem [thread:$0]  %s646_s2, 4352, %s19_s13, [#allocation3], %s545_s22, %s545_s22, %s546_s23  }
  0x11   :  { %542 = dma.done.wait [#allocation3], 4352  }
  0x12   :  { %543 = vsyncadd [#allocation3], 4294962944  ;;  %v547_v0 = vmov 0.0   ;;  %vm548_vm0 = vmmov 0   ;;  %vm75_vm1 = vcmask 64512   ;;  %v28_v1 = vld [vmem:[%s645_s1] sm:$0xff] }
  0x13   :  { %471 = vmatprep.subr.mxu0 %v547_v0  ;;  %473 = vmatprep.mubr.msk.f32.mxu0 %vm548_vm0, %v547_v0  ;;  %v70_v2 = vld [vmem:[%s644_s0] sm:$0xff]  ;;  %s549_s0 = smov 32   ;;  %v32_v22 = vld [vmem:[#allocation2 + $0x8] sm:$0xff]  ;;  %v34_v23 = vld [vmem:[#allocation2 + $0x18] sm:$0xff]  ;;  %s550_s2 = smov 64   ;;  %vm461_vm3 = vcmask 15360  }
  0x14   :  { %265 = vmatprep.mubr.f32.mxu1 %v547_v0  ;;  %472 = vmatpush3.msra.mxu0 %v28_v1  ;;  %v476_v24 = vpack.c.bf16 %v34_v23, %v32_v22  ;;  %v31_v25 = vld [vmem:[#allocation2] sm:$0xff]  ;;  %v33_v26 = vld [vmem:[#allocation2 + $0x10] sm:$0xff]  ;;  %v36_v28 = vld [vmem:[#allocation2 + $0x28] sm:$0xff] }
  0x15   :  { %474 = vmatmul.mubr.msk.f32.vlgmr.msra.gmra.mrb[0].mxu0 %vm75_vm1, %v70_v2  ;;  %v478_v27 = vpack.c.bf16 %v33_v26, %v31_v25  ;;  %v38_v29 = vld [vmem:[#allocation2 + $0x38] sm:$0xff]  ;;  %v35_v31 = vld [vmem:[#allocation2 + $0x20] sm:$0xff]  ;;  %v37_v32 = vld [vmem:[#allocation2 + $0x30] sm:$0xff] }
  0x16   :  { %477 = vmatprep.subr.bf16.mxu1 %v476_v24  ;;  %v480_v30 = vpack.c.bf16 %v38_v29, %v36_v28  ;;  %v482_v33 = vpack.c.bf16 %v37_v32, %v35_v31  ;;  %v40_v35 = vld [vmem:[#allocation2 + $0x48] sm:$0xff]  ;;  %v42_v36 = vld [vmem:[#allocation2 + $0x58] sm:$0xff]  ;;  %v39_v39 = vld [vmem:[#allocation2 + $0x40] sm:$0xff] }
  0x17   :  { %479 = vmatpush1.bf16.msra.mxu1 %v478_v27  ;;  %v484_v38 = vpack.c.bf16 %v42_v36, %v40_v35  ;;  %v41_v40 = vld [vmem:[#allocation2 + $0x50] sm:$0xff]  ;;  %v44_v42 = vld [vmem:[#allocation2 + $0x68] sm:$0xff]  ;;  %v46_v43 = vld [vmem:[#allocation2 + $0x78] sm:$0xff] }
  0x18   :  { %481 = vmatprep.subr.bf16.mxu1 %v480_v30  ;;  %v486_v41 = vpack.c.bf16 %v41_v40, %v39_v39  ;;  %v43_v44 = vld [vmem:[#allocation2 + $0x60] sm:$0xff]  ;;  %v488_v45 = vpack.c.bf16 %v46_v43, %v44_v42  ;;  %v45_v46 = vld [vmem:[#allocation2 + $0x70] sm:$0xff]  ;;  %v48_v47 = vld [vmem:[#allocation2 + $0x88] sm:$0xff] }
  0x19   :  { %v50_v48 = vld [vmem:[#allocation2 + $0x98] sm:$0xff]  ;;  %v490_v50 = vpack.c.bf16 %v45_v46, %v43_v44  ;;  %v47_v53 = vld [vmem:[#allocation2 + $0x80] sm:$0xff]  ;;  %v49_v54 = vld [vmem:[#allocation2 + $0x90] sm:$0xff] }
  0x1a   :  { %v492_v52 = vpack.c.bf16 %v50_v48, %v48_v47  ;;  %v52_v55 = vld [vmem:[#allocation2 + $0xa8] sm:$0xff]  ;;  %v54_v56 = vld [vmem:[#allocation2 + $0xb8] sm:$0xff]  ;;  %v494_v57 = vpack.c.bf16 %v49_v54, %v47_v53  ;;  %v51_v59 = vld [vmem:[#allocation2 + $0xa0] sm:$0xff] }
  0x1b   :  { %483 = vmatpush1.bf16.msra.mxu1 %v482_v33  ;;  %v496_v58 = vpack.c.bf16 %v54_v56, %v52_v55  ;;  %v53_v60 = vld [vmem:[#allocation2 + $0xb0] sm:$0xff]  ;;  %v56_v61 = vld [vmem:[#allocation2 + $0xc8] sm:$0xff]  ;;  %v58_v62 = vld [vmem:[#allocation2 + $0xd8] sm:$0xff] }
  0x1c   :  { %485 = vmatprep.subr.bf16.mxu1 %v484_v38  ;;  %v498_v63 = vpack.c.bf16 %v53_v60, %v51_v59  ;;  %v500_v1 = vpack.c.bf16 %v58_v62, %v56_v61  ;;  %v55_v2 = vld [vmem:[#allocation2 + $0xc0] sm:$0xff]  ;;  %v29_v23 = vld [vmem:[%s645_s1 + $0x8] sm:$0x1]  ;;  %v30_v27 = vld [vmem:[%s645_s1 + $0x9] sm:$0x1] }
  0x1f   :  { %487 = vmatpush1.bf16.msra.mxu1 %v486_v41 }
  0x20   :  { %489 = vmatprep.subr.bf16.mxu1 %v488_v45 }
  0x23   :  { %491 = vmatpush1.bf16.msra.mxu1 %v490_v50 }
  0x24   :  { %493 = vmatprep.subr.bf16.mxu1 %v492_v52 }
  0x27   :  { %495 = vmatpush1.bf16.msra.mxu1 %v494_v57 }
  0x28   :  { %497 = vmatprep.subr.bf16.mxu1 %v496_v58 }
  0x2b   :  { %499 = vmatpush1.bf16.msra.mxu1 %v498_v63 }
  0x2c   :  { %501 = vmatprep.subr.bf16.mxu1 %v500_v1 }
  0xe8   :  { %v593_v3 = vpop.f32.mrb[0].mxu0 }
  0xe9   :  { %v149_v4 = vrot.slane %v593_v3, 4  ;;  %v155_v5 = vmul.f32 %v593_v3, %v593_v3  ;;  %v475_v6 = vpop.f32.mrb[1].mxu0 }
  0xea   :  { %v62_v6 = vld [vmem:[#allocation2 + $0xf8] sm:$0xff] }
  0xeb   :  { %v150_v7 = vadd.f32 %v149_v4, %v593_v3  ;;  %v156_v8 = vrot.slane %v155_v5, 4  ;;  %v57_v4 = vld [vmem:[#allocation2 + $0xd0] sm:$0xff] }
  0xed   :  { %v151_v9 = vrot.slane %v150_v7, 2  ;;  %v157_v10 = vadd.f32 %v156_v8, %v155_v5  ;;  %v60_v5 = vld [vmem:[#allocation2 + $0xe8] sm:$0xff] }
  0xee   :  { %v504_v8 = vpack.c.bf16 %v62_v6, %v60_v5 }
  0xef   :  { %v152_v11 = vadd.f32 %v151_v9, %v150_v7  ;;  %v158_v12 = vrot.slane %v157_v10, 2  ;;  %v502_v7 = vpack.c.bf16 %v57_v4, %v55_v2  ;;  %v59_v9 = vld [vmem:[#allocation2 + $0xe0] sm:$0xff] }
  0xf1   :  { %v153_v13 = vrot.slane %v152_v11, 1  ;;  %v159_v14 = vadd.f32 %v158_v12, %v157_v10  ;;  %v61_v10 = vld [vmem:[#allocation2 + $0xf0] sm:$0xff]  ;;  %503 = vmatpush1.bf16.msra.mxu1 %v502_v7  ;;  %v68_v7 = vld [vmem:[#allocation2 + $0x108] sm:$0xc] }
  0xf2   :  { %505 = vmatprep.subr.bf16.mxu1 %v504_v8  ;;  %v67_v8 = vld [vmem:[#allocation2 + $0x100] sm:$0xc] }
  0xf3   :  { %v154_v15 = vadd.f32 %v153_v13, %v152_v11  ;;  %v160_v16 = vrot.slane %v159_v14, 1  ;;  %v506_v11 = vpack.c.bf16 %v61_v10, %v59_v9  ;;  %v388_v9 = vrot.slane %v68_v7, 2 }
  0xf4   :  { %v387_v10 = vrot.slane %v67_v8, 2 }
  0xf5   :  { %162 = vrot.lane.b32.xlu0 %v154_v15, %s546_s23  ;;  %v161_v17 = vadd.f32 %v160_v16, %v159_v14  ;;  %507 = vmatpush1.bf16.msra.mxu1 %v506_v11 }
  0xf6   :  { %391 = vmatprep.subr.mxu0 %v388_v9 }
  0xf7   :  { %392 = vmatpush1.xpose.msra.mxu0 %v387_v10 }
  0xf9   :  { %171 = vrot.lane.b32.xlu0 %v161_v17, %s546_s23 }
 0x167   :  { %v163_v18 = vpop.permute.xlu0 %162 }
 0x168   :  { %v164_v19 = vadd.f32 %v163_v18, %v154_v15 }
 0x16a   :  { %165 = vrot.lane.b32.xlu1 %v164_v19, %s549_s0 }
 0x16b   :  { %v172_v20 = vpop.permute.xlu0 %171 }
 0x16c   :  { %v173_v21 = vadd.f32 %v172_v20, %v161_v17 }
 0x16e   :  { %174 = vrot.lane.b32.xlu1 %v173_v21, %s549_s0 }
 0x1dc   :  { %v166_v34 = vpop.permute.xlu1 %165 }
 0x1dd   :  { %v167_v37 = vadd.f32 %v166_v34, %v164_v19 }
 0x1df   :  { %168 = vrot.lane.b32.xlu0 %v167_v37, %s550_s2 }
 0x1e0   :  { %v175_v49 = vpop.permute.xlu1 %174 }
 0x1e1   :  { %v176_v51 = vadd.f32 %v175_v49, %v173_v21  ;;  %v71_v21 = vlaneseq }
 0x1e3   :  { %177 = vrot.lane.b32.xlu1 %v176_v51, %s550_s2  ;;  %v603_v22 = vshrl.u32 %v71_v21, 7 }
 0x1e5   :  { %v609_v24 = vsub.s32 0, %v603_v22  ;;  %vm73_vm2 = vcmp.lt.s32.totalorder %v603_v22, 4 }
 0x1e6   :  { %v74_v34 = vsel %vm73_vm2, 1.0, %v547_v0 }
 0x251   :  { %v169_v12 = vpop.permute.xlu0 %168 }
 0x252   :  { %v170_v13 = vadd.f32 %v169_v12, %v167_v37 }
 0x254   :  { %v180_v14 = vmul.f32 0.03125, %v170_v13 }
 0x255   :  { %v178_v15 = vpop.permute.xlu1 %177 }
 0x256   :  { %v179_v16 = vadd.f32 %v178_v15, %v176_v51  ;;  %v182_v17 = vmul.f32 %v180_v14, %v180_v14 }
 0x258   :  { %v181_v18 = vmul.f32 0.03125, %v179_v16 }
 0x25a   :  { %v183_v19 = vsub.f32 %v181_v18, %v182_v17 }
 0x25c   :  { %v184_v20 = vadd.f32 1e-05, %v183_v19 }
 0x25e   :  { %516 = vrsqrt.f32 %v184_v20  ;;  %v551_v20 = vmov 1966171168  }
 0x25f   :  { %v321_v21 = vunpack.c.l.s4 %v551_v20 }
 0x268   :  { %v517_v25 = vpop.eup %516 }
 0x269   :  { %v186_v26 = vmul.f32 %v517_v25, %v29_v23  ;;  %v322_v23 = vunpack.c.0.s8 %v321_v21 }
 0x26b   :  { %v187_v28 = vmul.f32 %v186_v26, %v180_v14  ;;  %v192_v29 = vrot.slane %v186_v26, %v609_v24  ;;  %v325_v25 = vsub.s32 %v322_v23, %v603_v22 }
 0x26d   :  { %v188_v30 = vsub.f32 %v30_v27, %v187_v28  ;;  %v193_v31 = vmul.f32 %v192_v29, %v593_v3  ;;  %v64_v29 = vld [vmem:[#allocation2 + $0x100] ss:$8 sm:$0x3] }
 0x26f   :  { %v197_v32 = vrot.slane %v188_v30, %v609_v24 }
 0x271   :  { %v198_v33 = vadd.f32 %v197_v32, %v193_v31  ;;  %v343_v31 = vsub.s32 1, %v603_v22 }
 0x273   :  { %v199_v35 = vmax.f32 %v198_v33, 0.0 }
 0x275   :  { %v200_v36 = vmul.f32 %v199_v35, %v74_v34 }
 0x277   :  { %266 = vmatmul.mubr.f32.vlgmr.msra.gmra.mrb[0].mxu1 %v200_v36 }
 0x34a   :  { %v619_v37 = vpop.f32.mrb[0].mxu1 }
 0x34b   :  { %v272_v38 = vrot.slane %v619_v37, 4  ;;  %v284_v39 = vmul.f32 %v619_v37, %v619_v37  ;;  %v624_v40 = vpop.f32.mrb[1].mxu1 }
 0x34c   :  { %v278_v41 = vrot.slane %v624_v40, 4  ;;  %v285_v3 = vmul.f32 %v624_v40, %v624_v40 }
 0x34d   :  { %v273_v42 = vadd.f32 %v272_v38, %v619_v37  ;;  %v286_v0 = vrot.slane %v284_v39, 4 }
 0x34e   :  { %v279_v43 = vadd.f32 %v278_v41, %v624_v40  ;;  %v292_v44 = vrot.slane %v285_v3, 4  ;;  %v66_v41 = vld [vmem:[#allocation2 + $0x101] ss:$8 sm:$0x3] }
 0x34f   :  { %v274_v45 = vrot.slane %v273_v42, 2  ;;  %v287_v46 = vadd.f32 %v286_v0, %v284_v39 }
 0x350   :  { %v280_v47 = vrot.slane %v279_v43, 2  ;;  %v293_v48 = vadd.f32 %v292_v44, %v285_v3 }
 0x351   :  { %v275_v49 = vadd.f32 %v274_v45, %v273_v42  ;;  %v288_v50 = vrot.slane %v287_v46, 2 }
 0x352   :  { %v281_v51 = vadd.f32 %v280_v47, %v279_v43  ;;  %v294_v52 = vrot.slane %v293_v48, 2 }
 0x353   :  { %v276_v53 = vrot.slane %v275_v49, 1  ;;  %v289_v54 = vadd.f32 %v288_v50, %v287_v46 }
 0x354   :  { %v282_v55 = vrot.slane %v281_v51, 1  ;;  %v295_v56 = vadd.f32 %v294_v52, %v293_v48 }
 0x355   :  { %v277_v57 = vadd.f32 %v276_v53, %v275_v49  ;;  %v290_v58 = vrot.slane %v289_v54, 1  ;;  %v69_v49 = vld [vmem:[#allocation2 + $0x104] ss:$0 sm:$0xff] }
 0x356   :  { %v283_v59 = vadd.f32 %v282_v55, %v281_v51  ;;  %v296_v60 = vrot.slane %v295_v56, 1 }
 0x357   :  { %v291_v61 = vadd.f32 %v290_v58, %v289_v54 }
 0x358   :  { %v298_v62 = vadd.f32 %v283_v59, %v277_v57  ;;  %v297_v63 = vadd.f32 %v296_v60, %v295_v56 }
 0x35a   :  { %299 = vrot.lane.b32.xlu0 %v298_v62, %s549_s0  ;;  %v305_v1 = vadd.f32 %v297_v63, %v291_v61 }
 0x35c   :  { %306 = vrot.lane.b32.xlu1 %v305_v1, %s549_s0 }
 0x3cc   :  { %v300_v2 = vpop.permute.xlu0 %299 }
 0x3cd   :  { %v301_v4 = vadd.f32 %v300_v2, %v298_v62 }
 0x3ce   :  { %v307_v5 = vpop.permute.xlu1 %306 }
 0x3cf   :  { %v308_v6 = vadd.f32 %v307_v5, %v305_v1  ;;  %302 = vrot.lane.b32.xlu0 %v301_v4, %s550_s2 }
 0x3d1   :  { %309 = vrot.lane.b32.xlu1 %v308_v6, %s550_s2 }
 0x441   :  { %v303_v11 = vpop.permute.xlu0 %302 }
 0x442   :  { %v304_v12 = vadd.f32 %v303_v11, %v301_v4 }
 0x443   :  { %v310_v13 = vpop.permute.xlu1 %309 }
 0x444   :  { %v312_v14 = vmul.f32 0.03125, %v304_v12  ;;  %v311_v15 = vadd.f32 %v310_v13, %v308_v6 }
 0x446   :  { %v313_v16 = vmul.f32 0.03125, %v311_v15  ;;  %v314_v17 = vmul.f32 %v312_v14, %v312_v14 }
 0x448   :  { %v315_v18 = vsub.f32 %v313_v16, %v314_v17 }
 0x44a   :  { %v316_v19 = vadd.f32 1e-05, %v315_v18 }
 0x44c   :  { %518 = vrsqrt.f32 %v316_v19 }
 0x456   :  { %v519_v26 = vpop.eup %518 }
 0x457   :  { %v319_v27 = vcombine.low %v519_v26, %v519_v26 }
 0x459   :  { %v326_v28 = vrot.slane %v319_v27, %v325_v25 }
 0x45b   :  { %v333_v30 = vrot.slane %v326_v28, %v325_v25 }
 0x45d   :  { %v335_v32 = vmul.f32 %v333_v30, %v64_v29 }
 0x45f   :  { %v340_v33 = vrot.slane %v335_v32, %v609_v24  ;;  %v344_v34 = vrot.slane %v335_v32, %v343_v31 }
 0x461   :  { %v347_v35 = vmul.f32 %v340_v33, %v312_v14  ;;  %v348_v36 = vmul.f32 %v344_v34, %v312_v14  ;;  %v369_v0 = vmul.f32 %v344_v34, %v624_v40  ;;  %v368_v44 = vmul.f32 %v340_v33, %v619_v37 }
 0x463   :  { %v351_v38 = vcombine.low %v347_v35, %v348_v36 }
 0x465   :  { %v358_v39 = vrot.slane %v351_v38, %v325_v25 }
 0x467   :  { %v365_v3 = vrot.slane %v358_v39, %v325_v25 }
 0x469   :  { %v367_v42 = vsub.f32 %v66_v41, %v365_v3 }
 0x46b   :  { %v378_v43 = vrot.slane %v367_v42, %v343_v31  ;;  %v374_v45 = vrot.slane %v367_v42, %v609_v24 }
 0x46d   :  { %v382_v46 = vadd.f32 %v378_v43, %v369_v0  ;;  %v381_v22 = vadd.f32 %v374_v45, %v368_v44 }
 0x46f   :  { %v384_v47 = vmax.f32 %v382_v46, 0.0  ;;  %v383_v48 = vmax.f32 %v381_v22, 0.0 }
 0x471   :  { %455 = vmatprep.mubr.f32.mxu0 %v384_v47 }
 0x472   :  { %456 = vmatmul.mubr.f32.vlgmr.msra.gmra.mrb[2].mxu0 %v383_v48 }
 0x545   :  { %v457_v50 = vpop.f32.mrb[2].mxu0 }
 0x546   :  { %v458_v51 = vadd.f32 %v457_v50, %v69_v49  ;;  %v459_v52 = vpop.f32.mrb[3].mxu0 }
 0x548   :  { %462 = vst.msk [vmem:[%s647_s3] sm:$0xff] %vm461_vm3, %v458_v51 }
 0x549   :  { %467 = vsyncpa [#allocation3], 1 }

</bundles_post_ra>
